<compile_context>
chip_gen: v6e
topology: v6e:2x2x1
jax: 0.10.0
libtpu: 0.0.40
codegen_flags: <defaults>
</compile_context>

<pallas_src>
import functools
import math

import jax
import jax.numpy as jnp
from jax.experimental import pallas as pl
from jax.experimental.pallas import tpu as pltpu

NUM_CLASSES = 36
NEG_SCALE = 5.0
INIT_BIAS_SCALE = 0.1
FOCAL_ALPHA = 0.5
FOCAL_GAMMA = 2.0          # gamma=2 hard-coded as (1-pt)*(1-pt) in-kernel
LOSS_WEIGHT = 1.0

# Escape hatch: set False for an exact divide instead of the EUP approx
# reciprocal (~1e-3 rel. error in (1-pt)); relevant if a VJP is added or gamma
# is raised.
APPROX_RECIP = True

# Pad value for rows added by the lane-dense repack / edge tiles.  With
# s = (x + bias) * 5 ~ -5e9:  exp(-|s|) underflows to 0, max(s,0)=0, log1p(0)=0
# => bce = 0, (1-pt) = 0, loss = 0 exactly.  No NaN/Inf is ever produced.
_PAD_VALUE = -1e9


def _make_neg_branch_kernel(m_total: int, need_mask: bool):
    """Elementwise negative-branch focal-BCE partial-sum kernel.

    Closes over the true packed-row count so the edge-row clamp is only
    compiled in when the grid does not evenly divide the packed rows.
    """

    def kernel(score_ref, bias_ref, out_ref):
        # score_ref: (TM, PC)   packed logits, native dtype (upcast here)
        # bias_ref : (1, PC)    f32 per-class bias, tiled to the packed layout
        # out_ref  : (1, 128)   f32 lane-dense per-tile partial sum
        pid = pl.program_id(0)

        x = score_ref[...].astype(jnp.float32)
        tm, pc = x.shape

        s = (x + bias_ref[...]) * NEG_SCALE

        if need_mask:
            # Only the last tile can run past the array; clamp invalid rows to
            # the zero-loss value BEFORE the transcendentals (cheap (tm,1)
            # compare, broadcast select).
            row = jax.lax.broadcasted_iota(jnp.int32, (tm, 1), 0)
            valid = (pid * tm + row) < m_total
            s = jnp.where(valid, s, _PAD_VALUE)

        e = jnp.exp(-jnp.abs(s))                         # single EUP exp
        bce = jnp.maximum(s, 0.0) + jnp.log1p(e)         # stable BCE (y = 0)
        denom = 1.0 + e
        if APPROX_RECIP:
            inv = pl.reciprocal(denom, approx=True)
        else:
            inv = 1.0 / denom
        one_m_pt = jnp.where(s >= 0.0, 1.0, e) * inv     # (1 - pt), no 2nd exp
        loss = one_m_pt * one_m_pt * bce                 # gamma = 2

        # Lane-dense partial-sum block (unmasked vst); tiny final reduction
        # happens in the wrapper so the grid axis stays fully 'parallel'.
        out_ref[...] = jnp.broadcast_to(jnp.sum(loss), (1, 128))

    return kernel


def _round_up(x: int, m: int) -> int:
    return ((x + m - 1) // m) * m


@functools.partial(jax.jit, static_argnames=("tile_m",))
def resample_loss(cls_score, label, init_bias, *, tile_m: int = 256):
    """cls_score: (N, C) float, label: (N,) int, init_bias: (C,) float -> scalar f32.

    tile_m = packed rows per grid step (each packed row covers lcm(C,128)//C
    original rows; for C=36 that's 32, so the default is 8192 original rows).
    """
    n, c = cls_score.shape

    # ---- lane-dense repack: (N, C) -> (M, PC) with PC a multiple of 128 ----
    row_pack = math.lcm(c, 128) // c          # 32 for C=36
    pc = c * row_pack                         # 1152 for C=36
    n_pad = _round_up(n, row_pack)

    x = cls_score
    if n_pad != n:
        # NOTE: this pad is a full copy; it is skipped whenever N % row_pack == 0
        # (typical large batch sizes).  Padded rows contribute exactly 0 loss.
        x = jnp.pad(x, ((0, n_pad - n), (0, 0)),
                    constant_values=jnp.asarray(_PAD_VALUE, cls_score.dtype))
    m = n_pad // row_pack
    packed = x.reshape(m, pc)                 # row-major: contiguous, free

    bias_f32 = init_bias.astype(jnp.float32)
    bias_packed = jnp.tile(bias_f32, (row_pack,)).reshape(1, pc)

    # ---- tile sizing: big tiles, but >=2 tiles when possible (v7x megacore) --
    if m <= 8:
        tm = m                                # full-extent block (small inputs)
    else:
        tm = min(tile_m, max(8, _round_up(pl.cdiv(m, 2), 8)))
    num_tiles = pl.cdiv(m, tm)
    need_mask = (m % tm) != 0

    kernel = _make_neg_branch_kernel(m_total=m, need_mask=need_mask)

    itemsize = jnp.dtype(cls_score.dtype).itemsize
    partial_out = pl.pallas_call(
        kernel,
        out_shape=jax.ShapeDtypeStruct((1, num_tiles * 128), jnp.float32),
        grid=(num_tiles,),
        in_specs=[
            pl.BlockSpec((tm, pc), lambda i: (i, 0)),    # packed logits tile
            pl.BlockSpec((1, pc), lambda i: (0, 0)),     # packed bias (resident)
        ],
        # Each tile owns a distinct lane-dense (1,128) output block, so the
        # grid axis is truly parallel (v7x: 2 TensorCores), no accumulator.
        out_specs=pl.BlockSpec((1, 128), lambda i: (0, i)),
        compiler_params=pltpu.CompilerParams(
            dimension_semantics=("parallel",),
            vmem_limit_bytes=32 * 1024 * 1024,
        ),
        cost_estimate=pl.CostEstimate(
            flops=12 * m * pc,
            transcendentals=3 * m * pc,
            bytes_accessed=(m * pc * itemsize + pc * 4 + num_tiles * 128 * 4),
        ),
    )(packed, bias_packed)

    neg_sum = jnp.sum(partial_out.reshape(num_tiles, 128)[:, 0])

    # ---- per-row positive-class correction (N elements, pure JAX) -----------
    rows = jnp.arange(n)
    lab = label.astype(jnp.int32)
    z = cls_score[rows, lab].astype(jnp.float32) + bias_f32[lab]   # (N,) gathered
    s = z * NEG_SCALE
    # Negative-branch term the kernel already counted at the positive slots:
    neg_term = jnp.square(jax.nn.sigmoid(s)) * jax.nn.softplus(s)
    # True positive-branch term (y=1, no neg_scale): (1-pt)=sigmoid(-z), bce=softplus(-z)
    pos_term = jnp.square(jax.nn.sigmoid(-z)) * jax.nn.softplus(-z)

    a = FOCAL_ALPHA
    total = (1.0 - a) * neg_sum + jnp.sum(a * pos_term - (1.0 - a) * neg_term)
    return LOSS_WEIGHT * total / (n * c)


def resample_loss_reference(cls_score, label, init_bias):
    """Pure-JAX reference mirroring the PyTorch forward, for a sanity check."""
    y = jax.nn.one_hot(label, NUM_CLASSES, dtype=jnp.float32)
    logits = cls_score.astype(jnp.float32) + init_bias[None, :]
    logits = logits * (1.0 - y) * NEG_SCALE + logits * y
    bce = (jnp.maximum(logits, 0.0)
           - logits * y
           + jnp.log1p(jnp.exp(-jnp.abs(logits))))
    pt = jnp.exp(-bce)
    alpha_t = jnp.where(y == 1.0, FOCAL_ALPHA, 1.0 - FOCAL_ALPHA)
    loss = alpha_t * (1.0 - pt) ** FOCAL_GAMMA * bce
    return LOSS_WEIGHT * jnp.mean(loss)


if __name__ == "__main__":
    key = jax.random.PRNGKey(0)
    k_score, k_label = jax.random.split(key)

    N = 8
    C = NUM_CLASSES

    # Deterministic "dataset statistics" for the module parameters.
    class_freq = jnp.arange(1, C + 1, dtype=jnp.float32) * 10.0   # (36,)
    train_num = jnp.sum(class_freq)
    init_bias = -jnp.log(train_num / class_freq - 1.0) * INIT_BIAS_SCALE

    cls_score = jax.random.normal(k_score, (N, C), dtype=jnp.float32)
    label = jax.random.randint(k_label, (N,), 0, C, dtype=jnp.int32)

    out = jax.block_until_ready(resample_loss(cls_score, label, init_bias))
    ref = resample_loss_reference(cls_score, label, init_bias)

    # Tolerance accounts for pl.reciprocal(approx=True) in the (1-pt) term.
    assert jnp.allclose(out, ref, rtol=5e-3, atol=1e-5), (out, ref)

    print("KERNEL_OK")
</pallas_src>

<mosaic_0001>
module attributes {stable_mosaic.version = 11 : i64} {
  func.func @kernel(%arg0: i32, %arg1: memref<1x1152xf32, #tpu.memory_space<vmem>>, %arg2: memref<1x1152xf32, #tpu.memory_space<vmem>>, %arg3: memref<1x128xf32, #tpu.memory_space<vmem>>) attributes {dimension_semantics = [#tpu.dimension_semantics<parallel>], iteration_bounds = array<i64: 1>, scalar_prefetch = 0 : i64, scratch_operands = 0 : i64, tpu.core_type = #tpu.core_type<tc>, window_params = [{transform_indices = @transform_0, window_bounds = array<i64: 1, 1152>}, {pipeline_mode = #tpu.pipeline_mode<synchronous>, transform_indices = @transform_1, window_bounds = array<i64: 1, 1152>}, {transform_indices = @transform_2, window_bounds = array<i64: 1, 128>}]} {
    %c0 = arith.constant 0 : index
    %c0_0 = arith.constant 0 : index
    %0 = vector.load %arg1[%c0, %c0_0] : memref<1x1152xf32, #tpu.memory_space<vmem>>, vector<1x1152xf32>
    %c0_1 = arith.constant 0 : index
    %c0_2 = arith.constant 0 : index
    %1 = vector.load %arg2[%c0_1, %c0_2] : memref<1x1152xf32, #tpu.memory_space<vmem>>, vector<1x1152xf32>
    %2 = arith.addf %0, %1 : vector<1x1152xf32>
    %cst = arith.constant 5.000000e+00 : f32
    %3 = vector.broadcast %cst : f32 to vector<1x1152xf32>
    %4 = arith.mulf %2, %3 : vector<1x1152xf32>
    %5 = math.absf %4 : vector<1x1152xf32>
    %cst_3 = arith.constant 0.000000e+00 : f32
    %6 = vector.broadcast %cst_3 : f32 to vector<1x1152xf32>
    %7 = arith.subf %6, %5 : vector<1x1152xf32>
    %8 = math.exp %7 : vector<1x1152xf32>
    %cst_4 = arith.constant 0.000000e+00 : f32
    %9 = vector.broadcast %cst_4 : f32 to vector<1x1152xf32>
    %10 = arith.maximumf %4, %9 : vector<1x1152xf32>
    %11 = math.log1p %8 : vector<1x1152xf32>
    %12 = arith.addf %10, %11 : vector<1x1152xf32>
    %cst_5 = arith.constant 1.000000e+00 : f32
    %13 = vector.broadcast %cst_5 : f32 to vector<1x1152xf32>
    %14 = arith.addf %13, %8 : vector<1x1152xf32>
    %15 = tpu.reciprocal %14 {approx = true} : vector<1x1152xf32> -> vector<1x1152xf32>
    %cst_6 = arith.constant 0.000000e+00 : f32
    %16 = vector.broadcast %cst_6 : f32 to vector<1x1152xf32>
    %17 = arith.cmpf oge, %4, %16 : vector<1x1152xf32>
    %cst_7 = arith.constant 1.000000e+00 : f32
    %18 = vector.broadcast %cst_7 : f32 to vector<1x1152xf32>
    %19 = arith.select %17, %18, %8 : vector<1x1152xi1>, vector<1x1152xf32>
    %20 = arith.mulf %19, %15 : vector<1x1152xf32>
    %21 = arith.mulf %20, %20 : vector<1x1152xf32>
    %22 = arith.mulf %21, %12 : vector<1x1152xf32>
    %23 = vector.shape_cast %22 : vector<1x1152xf32> to vector<1x1x1152xf32>
    %cst_8 = arith.constant dense<0.000000e+00> : vector<1xf32>
    %24 = vector.multi_reduction <add>, %23, %cst_8 [1, 2] : vector<1x1x1152xf32> to vector<1xf32>
    %25 = vector.shape_cast %24 : vector<1xf32> to vector<1x1x1xf32>
    %26 = vector.extract %25[0, 0, 0] : f32 from vector<1x1x1xf32>
    %27 = vector.broadcast %26 : f32 to vector<1x128xf32>
    %c0_9 = arith.constant 0 : index
    %c0_10 = arith.constant 0 : index
    %28 = vector.load %arg3[%c0_9, %c0_10] : memref<1x128xf32, #tpu.memory_space<vmem>>, vector<1x128xf32>
    tpu.vector_store %arg3[%c0_9, %c0_10], %27 {strides = array<i32>} : memref<1x128xf32, #tpu.memory_space<vmem>>, vector<1x128xf32>,
    return
  }
  func.func @transform_0(%arg0: i32) -> (i32, i32) {
    %c0_i32 = arith.constant 0 : i32
    %c0_i32_0 = arith.constant 0 : i32
    return %arg0, %c0_i32 : i32, i32
  }
  func.func @transform_1(%arg0: i32) -> (i32, i32) {
    %c0_i32 = arith.constant 0 : i32
    %c0_i32_0 = arith.constant 0 : i32
    %c0_i32_1 = arith.constant 0 : i32
    return %c0_i32, %c0_i32_0 : i32, i32
  }
  func.func @transform_2(%arg0: i32) -> (i32, i32) {
    %c0_i32 = arith.constant 0 : i32
    %c0_i32_0 = arith.constant 0 : i32
    return %c0_i32, %arg0 : i32, i32
  }
}

</mosaic_0001>

<bundles_post_ra>
// kernel: tile.8
= control target key start
LH: loop header
LB: loop body
LE: loop exit
PB: predicated region body
PF: predicated region fallthrough
CT: control target
= control target key end

     0   :  { %s40_s0 = inlined_call_operand.vmem [shape: f32[36], index: 0, kind: input, shape index: {}]   ;;  %s41_s1 = inlined_call_operand.vmem [shape: f32[32,36], index: 1, kind: output, shape index: {}]  }
   0x1   :  { %v4_v0 = vld [vmem:[%s40_s0] ss:$0 sm:$0xff] }
   0x2   :  { %5 = vst [vmem:[%s41_s1] sm:$0xff] %v4_v0  ;;  %12 = vst [vmem:[%s41_s1 + $0x8] sm:$0xff] %v4_v0 }
   0x3   :  { %13 = vst [vmem:[%s41_s1 + $0x10] sm:$0xff] %v4_v0  ;;  %14 = vst [vmem:[%s41_s1 + $0x18] sm:$0xff] %v4_v0 }

// kernel: resample_loss.1
= control target key start
LH: loop header
LB: loop body
LE: loop exit
PB: predicated region body
PF: predicated region fallthrough
CT: control target
= control target key end

     0   :  { %v65_v21 = vlaneseq  ;;  %vm110_vm4 = vcmask 1040384   ;;  %s202_s0 = inlined_call_operand.vmem [shape: f32[1,1152], index: 0, kind: input, shape index: {}]   ;;  %s203_s1 = inlined_call_operand.vmem [shape: f32[1,1152], index: 1, kind: input, shape index: {}]   ;;  %s204_s2 = inlined_call_operand.vmem [shape: f32[1,128], index: 2, kind: output, shape index: {}]  }
   0x1   :  { %v11_v0 = vld [vmem:[%s202_s0] sm:$0xff]  ;;  %v12_v1 = vld [vmem:[%s202_s0 + $0x8] sm:$0x1] }
   0x2   :  { %v13_v2 = vld [vmem:[%s203_s1] sm:$0xff]  ;;  %v14_v3 = vld [vmem:[%s203_s1 + $0x8] sm:$0x1]  ;;  %v66_v25 = vshrl.u32 %v65_v21, 7 }
   0x3   :  { %v15_v4 = vadd.f32 %v13_v2, %v11_v0  ;;  %v16_v5 = vadd.f32 %v14_v3, %v12_v1 }
   0x4   :  { %v67_v41 = vsub.s32 0, %v66_v25  ;;  %v71_v43 = vsub.s32 1, %v66_v25  ;;  %v75_v44 = vsub.s32 2, %v66_v25  ;;  %v79_v45 = vsub.s32 3, %v66_v25 }
   0x5   :  { %v17_v6 = vmul.f32 5.0, %v15_v4  ;;  %v18_v7 = vmul.f32 5.0, %v16_v5  ;;  %v83_v50 = vsub.s32 4, %v66_v25  ;;  %v87_v51 = vsub.s32 5, %v66_v25 }
   0x6   :  { %v91_v58 = vsub.s32 6, %v66_v25  ;;  %v95_v1 = vsub.s32 7, %v66_v25 }
   0x7   :  { %v19_v8 = vand.u32 2147483647, %v17_v6  ;;  %v20_v9 = vand.u32 2147483647, %v18_v7  ;;  %vm53_vm0 = vcmp.ge.f32.partialorder %v17_v6, 0.0  ;;  %vm54_vm1 = vcmp.ge.f32.partialorder %v18_v7, 0.0 }
   0x8   :  { %v27_v27 = vmax.f32 %v17_v6, 0.0  ;;  %v28_v46 = vmax.f32 %v18_v7, 0.0 }
   0x9   :  { %v21_v10 = vsub.f32 0.0, %v19_v8  ;;  %v22_v11 = vsub.f32 0.0, %v20_v9 }
   0xb   :  { %v23_v12 = vmul.f32 1.442695, %v21_v10  ;;  %v25_v13 = vmul.f32 1.442695, %v22_v11 }
   0xd   :  { %145 = vpow2.f32 %v23_v12 }
   0xe   :  { %147 = vpow2.f32 %v25_v13 }
  0x1a   :  { %v146_v14 = vpop.eup %145 }
  0x1b   :  { %v148_v15 = vpop.eup %147  ;;  %v29_v16 = vadd.f32 1.0, %v146_v14  ;;  %v32_v18 = vmul.f32 -0.5, %v146_v14  ;;  %v35_v22 = vand.u32 2147483647, %v146_v14  ;;  %v55_v29 = vsel %vm53_vm0, 1.0, %v146_v14 }
  0x1c   :  { %v38_v17 = vadd.f32 1.0, %v148_v15  ;;  %v41_v20 = vmul.f32 -0.5, %v148_v15  ;;  %v44_v28 = vand.u32 2147483647, %v148_v15  ;;  %v56_v33 = vsel %vm54_vm1, 1.0, %v148_v15 }
  0x1d   :  { %149 = vlog2.f32 %v29_v16  ;;  %v33_v19 = vadd.f32 1.0, %v32_v18  ;;  %vm36_vm2 = vcmp.lt.f32.partialorder %v35_v22, 0.0004427343 }
  0x1e   :  { %151 = vlog2.f32 %v38_v17  ;;  %v42_v24 = vadd.f32 1.0, %v41_v20  ;;  %vm184_vm3 = vcmp.lt.f32.partialorder %v44_v28, 0.0004427343 }
  0x1f   :  { %153 = vrcp.f32 %v29_v16  ;;  %v34_v23 = vmul.f32 %v146_v14, %v33_v19 }
  0x20   :  { %155 = vrcp.f32 %v38_v17  ;;  %v43_v37 = vmul.f32 %v148_v15, %v42_v24 }
  0x2a   :  { %v150_v26 = vpop.eup %149 }
  0x2b   :  { %v152_v30 = vpop.eup %151  ;;  %v31_v31 = vmul.f32 0.6931472, %v150_v26 }
  0x2c   :  { %v154_v32 = vpop.eup %153  ;;  %v40_v36 = vmul.f32 0.6931472, %v152_v30 }
  0x2d   :  { %v156_v34 = vpop.eup %155  ;;  %v37_v35 = vsel %vm36_vm2, %v34_v23, %v31_v31  ;;  %v57_v38 = vmul.f32 %v154_v32, %v55_v29 }
  0x2e   :  { %v47_v40 = vadd.f32 %v37_v35, %v27_v27  ;;  %v58_v47 = vmul.f32 %v156_v34, %v56_v33  ;;  %v46_v48 = vsel %vm184_vm3, %v43_v37, %v40_v36 }
  0x2f   :  { %v59_v42 = vmul.f32 %v57_v38, %v57_v38  ;;  %v48_v56 = vadd.f32 %v46_v48, %v28_v46 }
  0x30   :  { %v60_v57 = vmul.f32 %v58_v47, %v58_v47 }
  0x31   :  { %v61_v49 = vmul.f32 %v59_v42, %v47_v40 }
  0x32   :  { %v62_v4 = vmul.f32 %v60_v57, %v48_v56 }
  0x33   :  { %v68_v52 = vrot.slane %v61_v49, %v67_v41  ;;  %v72_v53 = vrot.slane %v61_v49, %v71_v43  ;;  %v76_v54 = vrot.slane %v61_v49, %v75_v44  ;;  %v80_v55 = vrot.slane %v61_v49, %v79_v45 }
  0x34   :  { %v84_v59 = vrot.slane %v61_v49, %v83_v50  ;;  %v88_v0 = vrot.slane %v61_v49, %v87_v51  ;;  %v92_v5 = vrot.slane %v61_v49, %v91_v58  ;;  %v96_v8 = vrot.slane %v61_v49, %v95_v1 }
  0x35   :  { %v111_v60 = vsel %vm110_vm4, %v68_v52, 0.0  ;;  %v112_v61 = vsel %vm110_vm4, %v72_v53, 0.0  ;;  %v114_v62 = vsel %vm110_vm4, %v76_v54, 0.0  ;;  %v116_v2 = vsel %vm110_vm4, %v80_v55, 0.0 }
  0x36   :  { %v113_v63 = vadd.f32 %v112_v61, %v111_v60  ;;  %v118_v6 = vsel %vm110_vm4, %v84_v59, 0.0  ;;  %v120_v9 = vsel %vm110_vm4, %v88_v0, 0.0  ;;  %v100_v11 = vrot.slane %v62_v4, %v67_v41 }
  0x37   :  { %v122_v12 = vsel %vm110_vm4, %v92_v5, 0.0  ;;  %v124_v14 = vsel %vm110_vm4, %v96_v8, 0.0 }
  0x38   :  { %v115_v3 = vadd.f32 %v114_v62, %v113_v63  ;;  %v126_v16 = vsel %vm110_vm4, %v100_v11, 0.0 }
  0x3a   :  { %v117_v7 = vadd.f32 %v116_v2, %v115_v3 }
  0x3c   :  { %v119_v10 = vadd.f32 %v118_v6, %v117_v7 }
  0x3e   :  { %v121_v13 = vadd.f32 %v120_v9, %v119_v10 }
  0x40   :  { %v123_v15 = vadd.f32 %v122_v12, %v121_v13 }
  0x42   :  { %v125_v17 = vadd.f32 %v124_v14, %v123_v15 }
  0x44   :  { %v127_v18 = vadd.f32 %v126_v16, %v125_v17 }
  0x46   :  { %128 = vadd.xlane.f32.xlu0 %v127_v18 }
  0xcf   :  { %v129_v19 = vpop.xlane.xlu0 %128 }
  0xd0   :  { %v130_v20 = vrot.slane %v129_v19, 4 }
  0xd2   :  { %v131_v21 = vadd.f32 %v130_v20, %v129_v19 }
  0xd4   :  { %v132_v22 = vrot.slane %v131_v21, 2 }
  0xd6   :  { %v133_v23 = vadd.f32 %v132_v22, %v131_v21 }
  0xd8   :  { %v134_v24 = vrot.slane %v133_v23, 1 }
  0xda   :  { %v135_v25 = vadd.f32 %v134_v24, %v133_v23 }
  0xdc   :  { %143 = vpush %v135_v25 }
 0x10d   :  { %s144_s0 = spop %143 }
 0x10e   :  { %v137_v26 = vstv %s144_s0 }
 0x10f   :  { %138 = vst [vmem:[%s204_s2] sm:$0x1] %v137_v26 }

</bundles_post_ra>
